<compile_context>
chip_gen: v7x
topology: tpu7x:2x2x1
jax: 0.10.0
libtpu: 0.0.40
codegen_flags: <defaults>
</compile_context>

<pallas_src>
import jax
import jax.numpy as jnp
from jax.experimental import pallas as pl
from jax.experimental.pallas import tpu as pltpu


def _sigmoid_mul_kernel(gate_ref, x_ref, o_ref):
    # gate_ref: (TR, 1)    -- per-channel scalar gate
    # x_ref   : (TR, H*W)  -- activations for those channels
    # sigmoid in f32 on the EUP (cheap, off the VPU critical slot) ...
    g = jax.nn.sigmoid(gate_ref[...].astype(jnp.float32))
    x = x_ref[...]
    # ... multiply in the activation dtype (bf16 stays bf16 on v6e/v7x).
    o_ref[...] = (g.astype(x.dtype) * x).astype(o_ref.dtype)


def _vmem_capacity_bytes():
    """Per-core VMEM capacity; conservative fallback if the query fails."""
    try:
        return int(pltpu.get_tpu_info().vmem_capacity_bytes)
    except Exception:
        return 64 * 1024 * 1024  # v7x per-TC size: safe lower bound everywhere


def _sublane_multiple(dtype):
    """Rows per packed vreg sublane group: 8 (f32), 16 (bf16), 32 (int8/fp8)."""
    item = jnp.dtype(dtype).itemsize
    return max(8, 32 // max(item, 1))


def sigmoid_mul(gate_nchw, x_nchw, *, row_tile=512, donate_x=False):
    """Computes sigmoid(gate) * x with broadcasting, matching the PyTorch module.

    gate_nchw: (N, C, 1, 1)
    x_nchw   : (N, C, H, W)
    returns  : (N, C, H, W), dtype of x
    """
    n, c, h, w = x_nchw.shape
    assert gate_nchw.shape == (n, c, 1, 1)

    nc = n * c
    hw = h * w
    out_dtype = x_nchw.dtype
    x_item = jnp.dtype(x_nchw.dtype).itemsize
    sub = _sublane_multiple(x_nchw.dtype)

    # ---- derive row tile from a per-generation VMEM budget -----------------
    lanes = ((hw + 127) // 128) * 128              # lane-padded row width
    row_bytes = 2 * lanes * x_item + 128 * 4       # x row + out row + gate row (f32 pad)
    db_row_bytes = 2 * row_bytes                   # double-buffered

    capacity = _vmem_capacity_bytes()
    cap_ws = min(capacity // 2, 32 * 1024 * 1024)  # <=32 MiB working set (v7x-safe)

    tr = min(row_tile, nc, max(1, cap_ws // db_row_bytes))

    # Megacore: for big tensors force >=2 grid steps so the "parallel" row
    # axis shards across both TensorCores on v7x; keep one block for tiny shapes.
    total_bytes = nc * hw * x_item
    if total_bytes > (4 << 20) and nc >= 2 * sub:
        tr = min(tr, -(-nc // 2))                  # cdiv(nc, 2)

    if tr < nc:
        tr = max(sub, (tr // sub) * sub)           # dtype-dependent sublane multiple
    tr = min(tr, nc)

    # ---- scoped VMEM limit from the actual tiles, with headroom ------------
    needed = db_row_bytes * tr
    vmem_limit = max(2 * needed, 8 << 20)
    vmem_limit = min(vmem_limit, max(cap_ws, needed + (2 << 20)))
    vmem_limit = int(min(vmem_limit, capacity))

    gate2d = gate_nchw.reshape(nc, 1)
    x2d = x_nchw.reshape(nc, hw)

    grid = (pl.cdiv(nc, tr),)

    out2d = pl.pallas_call(
        _sigmoid_mul_kernel,
        out_shape=jax.ShapeDtypeStruct((nc, hw), out_dtype),
        grid=grid,
        in_specs=[
            pl.BlockSpec((tr, 1), lambda i: (i, 0)),
            pl.BlockSpec((tr, hw), lambda i: (i, 0)),
        ],
        out_specs=pl.BlockSpec((tr, hw), lambda i: (i, 0)),
        compiler_params=pltpu.CompilerParams(
            dimension_semantics=("parallel",),
            vmem_limit_bytes=vmem_limit,
        ),
        input_output_aliases=({1: 0} if donate_x else {}),
    )(gate2d, x2d)

    return out2d.reshape(n, c, h, w)


if __name__ == "__main__":
    key = jax.random.PRNGKey(0)
    k1, k2 = jax.random.split(key)

    # Shapes implied by the module's forward: x83=(1,208,1,1), x79=(1,208,14,14)
    x83 = jax.random.normal(k1, (1, 208, 1, 1), dtype=jnp.float32)
    x79 = jax.random.normal(k2, (1, 208, 14, 14), dtype=jnp.float32)

    ref = jax.nn.sigmoid(x83) * x79

    # Default path: single lane-dense block, grid=(1,) (launch-bound shape).
    out = sigmoid_mul(x83, x79)
    jax.block_until_ready(out)
    assert out.shape == (1, 208, 14, 14)
    assert jnp.allclose(out, ref, atol=1e-6), "mismatch vs reference (default tile)"

    # Small row tile: exercises the multi-step, ragged row-grid pipeline path.
    out2 = sigmoid_mul(x83, x79, row_tile=64)
    jax.block_until_ready(out2)
    assert jnp.allclose(out2, ref, atol=1e-6), "mismatch vs reference (row_tile=64)"

    print("KERNEL_OK")
</pallas_src>

<mosaic_0001>
module attributes {stable_mosaic.version = 11 : i64} {
  func.func @_sigmoid_mul_kernel(%arg0: i32, %arg1: memref<208x1xf32, #tpu.memory_space<vmem>>, %arg2: memref<208x196xf32, #tpu.memory_space<vmem>>, %arg3: memref<208x196xf32, #tpu.memory_space<vmem>>) attributes {dimension_semantics = [#tpu.dimension_semantics<parallel>], iteration_bounds = array<i64: 1>, scalar_prefetch = 0 : i64, scratch_operands = 0 : i64, tpu.core_type = #tpu.core_type<tc>, window_params = [{transform_indices = @transform_0, window_bounds = array<i64: 208, 1>}, {transform_indices = @transform_1, window_bounds = array<i64: 208, 196>}, {transform_indices = @transform_2, window_bounds = array<i64: 208, 196>}]} {
    %c0 = arith.constant 0 : index
    %c0_0 = arith.constant 0 : index
    %0 = vector.load %arg1[%c0, %c0_0] : memref<208x1xf32, #tpu.memory_space<vmem>>, vector<208x1xf32>
    %1 = arith.negf %0 : vector<208x1xf32>
    %2 = math.exp %1 : vector<208x1xf32>
    %cst = arith.constant 1.000000e+00 : f32
    %3 = vector.broadcast %cst : f32 to vector<208x1xf32>
    %4 = arith.addf %3, %2 : vector<208x1xf32>
    %5 = arith.divf %3, %4 : vector<208x1xf32>
    %c0_1 = arith.constant 0 : index
    %c0_2 = arith.constant 0 : index
    %6 = vector.load %arg2[%c0_1, %c0_2] : memref<208x196xf32, #tpu.memory_space<vmem>>, vector<208x196xf32>
    %7 = vector.broadcast %5 : vector<208x1xf32> to vector<208x196xf32>
    %8 = arith.mulf %7, %6 : vector<208x196xf32>
    %c0_3 = arith.constant 0 : index
    %c0_4 = arith.constant 0 : index
    %9 = vector.load %arg3[%c0_3, %c0_4] : memref<208x196xf32, #tpu.memory_space<vmem>>, vector<208x196xf32>
    tpu.vector_store %arg3[%c0_3, %c0_4], %8 {strides = array<i32>} : memref<208x196xf32, #tpu.memory_space<vmem>>, vector<208x196xf32>,
    return
  }
  func.func @transform_0(%arg0: i32) -> (i32, i32) {
    %c0_i32 = arith.constant 0 : i32
    %c0_i32_0 = arith.constant 0 : i32
    return %arg0, %c0_i32 : i32, i32
  }
  func.func @transform_1(%arg0: i32) -> (i32, i32) {
    %c0_i32 = arith.constant 0 : i32
    %c0_i32_0 = arith.constant 0 : i32
    return %arg0, %c0_i32 : i32, i32
  }
  func.func @transform_2(%arg0: i32) -> (i32, i32) {
    %c0_i32 = arith.constant 0 : i32
    %c0_i32_0 = arith.constant 0 : i32
    return %arg0, %c0_i32 : i32, i32
  }
}

</mosaic_0001>

<bundles_post_ra>
// kernel: tpu_custom_call.1
= control target key start
LH: loop header
LB: loop body
LE: loop exit
PB: predicated region body
PF: predicated region fallthrough
CT: control target
= control target key end

     0   :  { %v617_v0 = vmov 0   ;;  %vm428_vm0 = vcmask 556032   ;;  %s1049_s0 = inlined_call_operand.vmem [shape: f32[208,1], index: 0, kind: input, shape index: {}]   ;;  %s1050_s1 = inlined_call_operand.vmem [shape: f32[208,196], index: 1, kind: input, shape index: {}]   ;;  %s1051_s2 = inlined_call_operand.vmem [shape: f32[208,196], index: 2, kind: output, shape index: {}]  }
   0x1   :  { %512 = vset.pattern.permute.xlu1 %v617_v0  ;;  %511 = vset.pattern.permute.xlu0 %v617_v0  ;;  %v13_v1 = vld [vmem:[%s1049_s0 + $0x10] sm:$0xff]  ;;  %v11_v2 = vld [vmem:[%s1049_s0] sm:$0xff]  ;;  %v14_v3 = vld [vmem:[%s1049_s0 + $0x18] sm:$0xff] }
   0x2   :  { %v486_v4 = vmul.f32 -1.442695, %v13_v1  ;;  %v484_v5 = vmul.f32 -1.442695, %v11_v2  ;;  %v487_v6 = vmul.f32 -1.442695, %v14_v3 }
   0x3   :  { %v12_v7 = vld [vmem:[%s1049_s0 + $0x8] sm:$0xff]  ;;  %v15_v9 = vld [vmem:[%s1049_s0 + $0x20] sm:$0xff]  ;;  %v18_v13 = vld [vmem:[%s1049_s0 + $0x38] sm:$0xff] }
   0x4   :  { %v16_v8 = vld [vmem:[%s1049_s0 + $0x28] sm:$0xff]  ;;  %513 = vpow2.f32 %v486_v4  ;;  %v485_v10 = vmul.f32 -1.442695, %v12_v7  ;;  %v488_v12 = vmul.f32 -1.442695, %v15_v9  ;;  %v17_v14 = vld [vmem:[%s1049_s0 + $0x30] sm:$0xff] }
   0x5   :  { %v489_v11 = vmul.f32 -1.442695, %v16_v8  ;;  %515 = vpow2.f32 %v484_v5  ;;  %v20_v15 = vld [vmem:[%s1049_s0 + $0x48] sm:$0xff]  ;;  %v491_v16 = vmul.f32 -1.442695, %v18_v13  ;;  %v19_v18 = vld [vmem:[%s1049_s0 + $0x40] sm:$0xff] }
   0x6   :  { %517 = vpow2.f32 %v487_v6  ;;  %v490_v17 = vmul.f32 -1.442695, %v17_v14  ;;  %v22_v19 = vld [vmem:[%s1049_s0 + $0x58] sm:$0xff]  ;;  %v493_v20 = vmul.f32 -1.442695, %v20_v15  ;;  %v21_v21 = vld [vmem:[%s1049_s0 + $0x50] sm:$0xff] }
   0x7   :  { %519 = vpow2.f32 %v485_v10  ;;  %v492_v22 = vmul.f32 -1.442695, %v19_v18  ;;  %v495_v23 = vmul.f32 -1.442695, %v22_v19  ;;  %v494_v24 = vmul.f32 -1.442695, %v21_v21 }
   0x8   :  { %521 = vpow2.f32 %v489_v11  ;;  %v24_v26 = vld [vmem:[%s1049_s0 + $0x68] sm:$0xff]  ;;  %v23_v46 = vld [vmem:[%s1049_s0 + $0x60] sm:$0xff]  ;;  %v26_v49 = vld [vmem:[%s1049_s0 + $0x78] sm:$0xff] }
   0x9   :  { %523 = vpow2.f32 %v488_v12  ;;  %v497_v33 = vmul.f32 -1.442695, %v24_v26  ;;  %v25_v52 = vld [vmem:[%s1049_s0 + $0x70] sm:$0xff]  ;;  %v496_v54 = vmul.f32 -1.442695, %v23_v46  ;;  %v28_v55 = vld [vmem:[%s1049_s0 + $0x88] sm:$0xff] }
   0xa   :  { %525 = vpow2.f32 %v491_v16  ;;  %v499_v57 = vmul.f32 -1.442695, %v26_v49  ;;  %v27_v58 = vld [vmem:[%s1049_s0 + $0x80] sm:$0xff]  ;;  %v498_v60 = vmul.f32 -1.442695, %v25_v52  ;;  %v30_v61 = vld [vmem:[%s1049_s0 + $0x98] sm:$0xff] }
   0xb   :  { %527 = vpow2.f32 %v490_v17  ;;  %v501_v63 = vmul.f32 -1.442695, %v28_v55  ;;  %v29_v0 = vld [vmem:[%s1049_s0 + $0x90] sm:$0xff]  ;;  %v500_v2 = vmul.f32 -1.442695, %v27_v58  ;;  %v32_v5 = vld [vmem:[%s1049_s0 + $0xa8] sm:$0xff] }
   0xc   :  { %529 = vpow2.f32 %v493_v20  ;;  %v503_v4 = vmul.f32 -1.442695, %v30_v61  ;;  %v502_v7 = vmul.f32 -1.442695, %v29_v0  ;;  %v31_v9 = vld [vmem:[%s1049_s0 + $0xa0] sm:$0xff]  ;;  %v34_v12 = vld [vmem:[%s1049_s0 + $0xb8] sm:$0xff] }
   0xd   :  { %531 = vpow2.f32 %v492_v22  ;;  %v505_v11 = vmul.f32 -1.442695, %v32_v5  ;;  %v33_v15 = vld [vmem:[%s1049_s0 + $0xb0] sm:$0xff]  ;;  %v504_v17 = vmul.f32 -1.442695, %v31_v9  ;;  %v193_v5 = vld [vmem:[%s1050_s1] sm:$0xff] }
   0xe   :  { %v514_v25 = vpop.eup %513  ;;  %533 = vpow2.f32 %v495_v23  ;;  %v507_v19 = vmul.f32 -1.442695, %v34_v12  ;;  %v506_v21 = vmul.f32 -1.442695, %v33_v15  ;;  %v36_v23 = vld [vmem:[%s1049_s0 + $0xc8] sm:$0xff]  ;;  %v195_v15 = vld [vmem:[%s1050_s1 + $0x10] sm:$0xff] }
   0xf   :  { %v516_v27 = vpop.eup %515  ;;  %v117_v28 = vadd.f32 1.0, %v514_v25  ;;  %535 = vpow2.f32 %v494_v24 }
  0x10   :  { %v518_v29 = vpop.eup %517  ;;  %v115_v30 = vadd.f32 1.0, %v516_v27  ;;  %v35_v27 = vld [vmem:[%s1049_s0 + $0xc0] sm:$0xff] }
  0x11   :  { %v520_v31 = vpop.eup %519  ;;  %537 = vrcp.f32 %v117_v28  ;;  %v118_v32 = vadd.f32 1.0, %v518_v29 }
  0x12   :  { %v522_v34 = vpop.eup %521  ;;  %539 = vrcp.f32 %v115_v30  ;;  %v116_v35 = vadd.f32 1.0, %v520_v31  ;;  %v509_v30 = vmul.f32 -1.442695, %v36_v23  ;;  %v203_v23 = vld [vmem:[%s1050_s1 + $0x50] sm:$0xff] }
  0x13   :  { %v524_v36 = vpop.eup %523  ;;  %541 = vrcp.f32 %v118_v32  ;;  %v120_v37 = vadd.f32 1.0, %v522_v34 }
  0x14   :  { %v526_v38 = vpop.eup %525  ;;  %543 = vrcp.f32 %v116_v35  ;;  %v119_v39 = vadd.f32 1.0, %v524_v36  ;;  %v508_v35 = vmul.f32 -1.442695, %v35_v27 }
  0x15   :  { %v528_v40 = vpop.eup %527  ;;  %v122_v41 = vadd.f32 1.0, %v526_v38  ;;  %545 = vpow2.f32 %v497_v33 }
  0x16   :  { %v530_v42 = vpop.eup %529  ;;  %547 = vrcp.f32 %v120_v37  ;;  %v121_v43 = vadd.f32 1.0, %v528_v40 }
  0x17   :  { %v532_v44 = vpop.eup %531  ;;  %549 = vrcp.f32 %v119_v39  ;;  %v124_v45 = vadd.f32 1.0, %v530_v42 }
  0x18   :  { %v534_v47 = vpop.eup %533  ;;  %551 = vrcp.f32 %v122_v41  ;;  %v123_v48 = vadd.f32 1.0, %v532_v44 }
  0x19   :  { %v536_v50 = vpop.eup %535  ;;  %553 = vrcp.f32 %v121_v43  ;;  %v126_v51 = vadd.f32 1.0, %v534_v47 }
  0x1a   :  { %555 = vrcp.f32 %v124_v45  ;;  %v125_v53 = vadd.f32 1.0, %v536_v50 }
  0x1b   :  { %v538_v56 = vpop.eup %537  ;;  %557 = vrcp.f32 %v123_v48 }
  0x1c   :  { %v540_v59 = vpop.eup %539  ;;  %257 = vperm.xlu1 %512, %v538_v56   ;;  %559 = vrcp.f32 %v126_v51 }
  0x1d   :  { %v542_v62 = vpop.eup %541  ;;  %247 = vperm.xlu0 %511, %v540_v59   ;;  %561 = vrcp.f32 %v125_v53 }
  0x1e   :  { %v544_v1 = vpop.eup %543  ;;  %563 = vpow2.f32 %v496_v54 }
  0x1f   :  { %v546_v3 = vpop.eup %545  ;;  %565 = vpow2.f32 %v499_v57 }
  0x20   :  { %v548_v6 = vpop.eup %547  ;;  %262 = vperm.xlu1 %512, %v542_v62   ;;  %567 = vpow2.f32 %v498_v60  ;;  %v128_v14 = vadd.f32 1.0, %v546_v3  ;;  %v197_v3 = vld [vmem:[%s1050_s1 + $0x20] sm:$0xff] }
  0x21   :  { %v550_v8 = vpop.eup %549  ;;  %252 = vperm.xlu0 %511, %v544_v1   ;;  %569 = vpow2.f32 %v501_v63 }
  0x22   :  { %v552_v10 = vpop.eup %551  ;;  %571 = vpow2.f32 %v500_v2 }
  0x23   :  { %v554_v13 = vpop.eup %553  ;;  %573 = vpow2.f32 %v503_v4  ;;  %v198_v4 = vld [vmem:[%s1050_s1 + $0x28] sm:$0xff] }
  0x24   :  { %v556_v16 = vpop.eup %555  ;;  %272 = vperm.xlu1 %512, %v548_v6   ;;  %575 = vpow2.f32 %v502_v7  ;;  %v194_v6 = vld [vmem:[%s1050_s1 + $0x8] sm:$0xff] }
  0x25   :  { %v558_v18 = vpop.eup %557  ;;  %267 = vperm.xlu0 %511, %v550_v8   ;;  %577 = vpow2.f32 %v505_v11 }
  0x26   :  { %v560_v20 = vpop.eup %559  ;;  %579 = vrcp.f32 %v128_v14  ;;  %v200_v14 = vld [vmem:[%s1050_s1 + $0x38] sm:$0xff] }
  0x27   :  { %v562_v22 = vpop.eup %561  ;;  %581 = vpow2.f32 %v504_v17 }
  0x28   :  { %v564_v24 = vpop.eup %563  ;;  %282 = vperm.xlu1 %512, %v552_v10   ;;  %583 = vpow2.f32 %v507_v19 }
  0x29   :  { %v566_v25 = vpop.eup %565  ;;  %277 = vperm.xlu0 %511, %v554_v13   ;;  %v127_v26 = vadd.f32 1.0, %v564_v24  ;;  %585 = vpow2.f32 %v506_v21  ;;  %v199_v13 = vld [vmem:[%s1050_s1 + $0x30] sm:$0xff]  ;;  %v204_v24 = vld [vmem:[%s1050_s1 + $0x58] sm:$0xff] }
  0x2a   :  { %v568_v28 = vpop.eup %567  ;;  %v130_v29 = vadd.f32 1.0, %v566_v25  ;;  %v201_v25 = vld [vmem:[%s1050_s1 + $0x40] sm:$0xff] }
  0x2b   :  { %v570_v31 = vpop.eup %569  ;;  %587 = vrcp.f32 %v127_v26  ;;  %v129_v32 = vadd.f32 1.0, %v568_v28  ;;  %v202_v26 = vld [vmem:[%s1050_s1 + $0x48] sm:$0xff] }
  0x2c   :  { %v572_v33 = vpop.eup %571  ;;  %292 = vperm.xlu1 %512, %v556_v16   ;;  %589 = vrcp.f32 %v130_v29  ;;  %v132_v34 = vadd.f32 1.0, %v570_v31  ;;  %v196_v16 = vld [vmem:[%s1050_s1 + $0x18] sm:$0xff] }
  0x2d   :  { %v574_v36 = vpop.eup %573  ;;  %287 = vperm.xlu0 %511, %v558_v18   ;;  %591 = vrcp.f32 %v129_v32  ;;  %v131_v37 = vadd.f32 1.0, %v572_v33  ;;  %v207_v33 = vld [vmem:[%s1050_s1 + $0x70] sm:$0xff] }
  0x2e   :  { %v576_v38 = vpop.eup %575  ;;  %593 = vpow2.f32 %v509_v30  ;;  %v134_v39 = vadd.f32 1.0, %v574_v36  ;;  %v206_v36 = vld [vmem:[%s1050_s1 + $0x68] sm:$0xff] }
  0x2f   :  { %595 = vrcp.f32 %v132_v34  ;;  %v578_v40 = vpop.eup %577  ;;  %v133_v42 = vadd.f32 1.0, %v576_v38  ;;  %v208_v34 = vld [vmem:[%s1050_s1 + $0x78] sm:$0xff] }
  0x30   :  { %302 = vperm.xlu1 %512, %v560_v20   ;;  %597 = vpow2.f32 %v508_v35  ;;  %v580_v41 = vpop.eup %579  ;;  %v136_v45 = vadd.f32 1.0, %v578_v40  ;;  %v205_v35 = vld [vmem:[%s1050_s1 + $0x60] sm:$0xff] }
  0x31   :  { %297 = vperm.xlu0 %511, %v562_v22   ;;  %599 = vrcp.f32 %v131_v37  ;;  %v582_v43 = vpop.eup %581 }
  0x32   :  { %v584_v44 = vpop.eup %583  ;;  %601 = vrcp.f32 %v134_v39  ;;  %v135_v48 = vadd.f32 1.0, %v582_v43  ;;  %v211_v43 = vld [vmem:[%s1050_s1 + $0x90] sm:$0xff] }
  0x33   :  { %v586_v46 = vpop.eup %585  ;;  %603 = vrcp.f32 %v133_v42  ;;  %v138_v51 = vadd.f32 1.0, %v584_v44  ;;  %v212_v44 = vld [vmem:[%s1050_s1 + $0x98] sm:$0xff] }
  0x34   :  { %312 = vperm.xlu1 %512, %v580_v41   ;;  %605 = vrcp.f32 %v136_v45  ;;  %v137_v54 = vadd.f32 1.0, %v586_v46  ;;  %v209_v45 = vld [vmem:[%s1050_s1 + $0x80] sm:$0xff]  ;;  %v210_v46 = vld [vmem:[%s1050_s1 + $0x88] sm:$0xff] }
  0x35   :  { %v588_v47 = vpop.eup %587  ;;  %607 = vrcp.f32 %v135_v48 }
  0x36   :  { %v590_v49 = vpop.eup %589  ;;  %307 = vperm.xlu0 %511, %v588_v47   ;;  %609 = vrcp.f32 %v138_v51 }
  0x37   :  { %v592_v50 = vpop.eup %591  ;;  %611 = vrcp.f32 %v137_v54  ;;  %v216_v54 = vld [vmem:[%s1050_s1 + $0xb8] sm:$0xff] }
  0x38   :  { %v594_v52 = vpop.eup %593  ;;  %322 = vperm.xlu1 %512, %v590_v49  }
  0x39   :  { %v596_v53 = vpop.eup %595  ;;  %v140_v57 = vadd.f32 1.0, %v594_v52 }
  0x3a   :  { %v598_v55 = vpop.eup %597  ;;  %317 = vperm.xlu0 %511, %v592_v50  }
  0x3b   :  { %v600_v56 = vpop.eup %599  ;;  %v139_v59 = vadd.f32 1.0, %v598_v55  ;;  %613 = vrcp.f32 %v140_v57  ;;  %v213_v55 = vld [vmem:[%s1050_s1 + $0xa0] sm:$0xff] }
  0x3c   :  { %332 = vperm.xlu1 %512, %v596_v53   ;;  %v602_v58 = vpop.eup %601  ;;  %v215_v53 = vld [vmem:[%s1050_s1 + $0xb0] sm:$0xff] }
  0x3d   :  { %v604_v60 = vpop.eup %603  ;;  %615 = vrcp.f32 %v139_v59 }
  0x3e   :  { %327 = vperm.xlu0 %511, %v600_v56   ;;  %v606_v61 = vpop.eup %605  ;;  %v214_v56 = vld [vmem:[%s1050_s1 + $0xa8] sm:$0xff] }
  0x3f   :  { %v608_v62 = vpop.eup %607 }
  0x40   :  { %342 = vperm.xlu1 %512, %v602_v58   ;;  %v610_v63 = vpop.eup %609 }
  0x41   :  { %v612_v0 = vpop.eup %611 }
  0x42   :  { %337 = vperm.xlu0 %511, %v604_v60  }
  0x44   :  { %352 = vperm.xlu1 %512, %v606_v61  }
  0x45   :  { %v614_v1 = vpop.eup %613 }
  0x46   :  { %347 = vperm.xlu0 %511, %v608_v62  }
  0x47   :  { %v616_v2 = vpop.eup %615 }
  0x48   :  { %362 = vperm.xlu1 %512, %v610_v63   ;;  %v219_v63 = vld [vmem:[%s1050_s1 + $0xd0] sm:$0xff] }
  0x4a   :  { %357 = vperm.xlu0 %511, %v612_v0   ;;  %v220_v0 = vld [vmem:[%s1050_s1 + $0xd8] sm:$0xff] }
  0x4c   :  { %372 = vperm.xlu1 %512, %v614_v1  }
  0x4e   :  { %367 = vperm.xlu0 %511, %v616_v2   ;;  %v217_v2 = vld [vmem:[%s1050_s1 + $0xc0] sm:$0xff] }
  0x9b   :  { %v258_v7 = vpop.permute.xlu1 %257 }
  0x9c   :  { %v379_v8 = vmul.f32 %v258_v7, %v197_v3  ;;  %v380_v9 = vmul.f32 %v258_v7, %v198_v4  ;;  %v248_v10 = vpop.permute.xlu0 %247  ;;  %v218_v3 = vld [vmem:[%s1050_s1 + $0xc8] sm:$0xff]  ;;  %v223_v7 = vld [vmem:[%s1050_s1 + $0xf0] sm:$0xff] }
  0x9d   :  { %v375_v11 = vmul.f32 %v248_v10, %v193_v5  ;;  %v376_v12 = vmul.f32 %v248_v10, %v194_v6 }
  0x9e   :  { %432 = vst [vmem:[%s1051_s2 + $0x20] sm:$0xff] %v379_v8  ;;  %433 = vst.msk [vmem:[%s1051_s2 + $0x28] sm:$0xff] %vm428_vm0, %v380_v9  ;;  %v224_v8 = vld [vmem:[%s1050_s1 + $0xf8] sm:$0xff] }
  0x9f   :  { %427 = vst [vmem:[%s1051_s2] sm:$0xff] %v375_v11  ;;  %429 = vst.msk [vmem:[%s1051_s2 + $0x8] sm:$0xff] %vm428_vm0, %v376_v12  ;;  %v263_v17 = vpop.permute.xlu1 %262  ;;  %v221_v12 = vld [vmem:[%s1050_s1 + $0xe0] sm:$0xff] }
  0xa0   :  { %v381_v18 = vmul.f32 %v263_v17, %v199_v13  ;;  %v382_v19 = vmul.f32 %v263_v17, %v200_v14  ;;  %v253_v20 = vpop.permute.xlu0 %252  ;;  %v222_v13 = vld [vmem:[%s1050_s1 + $0xe8] sm:$0xff]  ;;  %v227_v17 = vld [vmem:[%s1050_s1 + $0x110] sm:$0xff] }
  0xa1   :  { %v377_v21 = vmul.f32 %v253_v20, %v195_v15  ;;  %v378_v22 = vmul.f32 %v253_v20, %v196_v16 }
  0xa2   :  { %434 = vst [vmem:[%s1051_s2 + $0x30] sm:$0xff] %v381_v18  ;;  %435 = vst.msk [vmem:[%s1051_s2 + $0x38] sm:$0xff] %vm428_vm0, %v382_v19  ;;  %v228_v18 = vld [vmem:[%s1050_s1 + $0x118] sm:$0xff] }
  0xa3   :  { %430 = vst [vmem:[%s1051_s2 + $0x10] sm:$0xff] %v377_v21  ;;  %431 = vst.msk [vmem:[%s1051_s2 + $0x18] sm:$0xff] %vm428_vm0, %v378_v22  ;;  %v273_v27 = vpop.permute.xlu1 %272  ;;  %v225_v22 = vld [vmem:[%s1050_s1 + $0x100] sm:$0xff] }
  0xa4   :  { %v385_v28 = vmul.f32 %v273_v27, %v203_v23  ;;  %v386_v29 = vmul.f32 %v273_v27, %v204_v24  ;;  %v268_v30 = vpop.permute.xlu0 %267  ;;  %v226_v23 = vld [vmem:[%s1050_s1 + $0x108] sm:$0xff]  ;;  %v231_v27 = vld [vmem:[%s1050_s1 + $0x130] sm:$0xff] }
  0xa5   :  { %v383_v31 = vmul.f32 %v268_v30, %v201_v25  ;;  %v384_v32 = vmul.f32 %v268_v30, %v202_v26 }
  0xa6   :  { %438 = vst [vmem:[%s1051_s2 + $0x50] sm:$0xff] %v385_v28  ;;  %439 = vst.msk [vmem:[%s1051_s2 + $0x58] sm:$0xff] %vm428_vm0, %v386_v29  ;;  %v232_v28 = vld [vmem:[%s1050_s1 + $0x138] sm:$0xff] }
  0xa7   :  { %436 = vst [vmem:[%s1051_s2 + $0x40] sm:$0xff] %v383_v31  ;;  %437 = vst.msk [vmem:[%s1051_s2 + $0x48] sm:$0xff] %vm428_vm0, %v384_v32  ;;  %v283_v37 = vpop.permute.xlu1 %282  ;;  %v229_v32 = vld [vmem:[%s1050_s1 + $0x120] sm:$0xff] }
  0xa8   :  { %v389_v38 = vmul.f32 %v283_v37, %v207_v33  ;;  %v390_v39 = vmul.f32 %v283_v37, %v208_v34  ;;  %v278_v40 = vpop.permute.xlu0 %277  ;;  %v230_v33 = vld [vmem:[%s1050_s1 + $0x128] sm:$0xff]  ;;  %v235_v37 = vld [vmem:[%s1050_s1 + $0x150] sm:$0xff] }
  0xa9   :  { %v387_v41 = vmul.f32 %v278_v40, %v205_v35  ;;  %v388_v42 = vmul.f32 %v278_v40, %v206_v36 }
  0xaa   :  { %442 = vst [vmem:[%s1051_s2 + $0x70] sm:$0xff] %v389_v38  ;;  %443 = vst.msk [vmem:[%s1051_s2 + $0x78] sm:$0xff] %vm428_vm0, %v390_v39  ;;  %v236_v38 = vld [vmem:[%s1050_s1 + $0x158] sm:$0xff] }
  0xab   :  { %440 = vst [vmem:[%s1051_s2 + $0x60] sm:$0xff] %v387_v41  ;;  %441 = vst.msk [vmem:[%s1051_s2 + $0x68] sm:$0xff] %vm428_vm0, %v388_v42  ;;  %v293_v47 = vpop.permute.xlu1 %292  ;;  %v233_v42 = vld [vmem:[%s1050_s1 + $0x140] sm:$0xff] }
  0xac   :  { %v393_v48 = vmul.f32 %v293_v47, %v211_v43  ;;  %v394_v49 = vmul.f32 %v293_v47, %v212_v44  ;;  %v288_v50 = vpop.permute.xlu0 %287  ;;  %v234_v43 = vld [vmem:[%s1050_s1 + $0x148] sm:$0xff]  ;;  %v239_v47 = vld [vmem:[%s1050_s1 + $0x170] sm:$0xff] }
  0xad   :  { %v391_v51 = vmul.f32 %v288_v50, %v209_v45  ;;  %v392_v52 = vmul.f32 %v288_v50, %v210_v46 }
  0xae   :  { %446 = vst [vmem:[%s1051_s2 + $0x90] sm:$0xff] %v393_v48  ;;  %447 = vst.msk [vmem:[%s1051_s2 + $0x98] sm:$0xff] %vm428_vm0, %v394_v49  ;;  %v240_v48 = vld [vmem:[%s1050_s1 + $0x178] sm:$0xff] }
  0xaf   :  { %444 = vst [vmem:[%s1051_s2 + $0x80] sm:$0xff] %v391_v51  ;;  %445 = vst.msk [vmem:[%s1051_s2 + $0x88] sm:$0xff] %vm428_vm0, %v392_v52  ;;  %v303_v57 = vpop.permute.xlu1 %302  ;;  %v237_v52 = vld [vmem:[%s1050_s1 + $0x160] sm:$0xff] }
  0xb0   :  { %v397_v58 = vmul.f32 %v303_v57, %v215_v53  ;;  %v398_v59 = vmul.f32 %v303_v57, %v216_v54  ;;  %v298_v60 = vpop.permute.xlu0 %297  ;;  %v238_v53 = vld [vmem:[%s1050_s1 + $0x168] sm:$0xff]  ;;  %v243_v57 = vld [vmem:[%s1050_s1 + $0x190] sm:$0xff] }
  0xb1   :  { %v395_v61 = vmul.f32 %v298_v60, %v213_v55  ;;  %v396_v62 = vmul.f32 %v298_v60, %v214_v56 }
  0xb2   :  { %450 = vst [vmem:[%s1051_s2 + $0xb0] sm:$0xff] %v397_v58  ;;  %451 = vst.msk [vmem:[%s1051_s2 + $0xb8] sm:$0xff] %vm428_vm0, %v398_v59  ;;  %v244_v58 = vld [vmem:[%s1050_s1 + $0x198] sm:$0xff] }
  0xb3   :  { %448 = vst [vmem:[%s1051_s2 + $0xa0] sm:$0xff] %v395_v61  ;;  %449 = vst.msk [vmem:[%s1051_s2 + $0xa8] sm:$0xff] %vm428_vm0, %v396_v62  ;;  %v313_v1 = vpop.permute.xlu1 %312  ;;  %v241_v62 = vld [vmem:[%s1050_s1 + $0x180] sm:$0xff] }
  0xb4   :  { %v401_v4 = vmul.f32 %v313_v1, %v219_v63  ;;  %v402_v5 = vmul.f32 %v313_v1, %v220_v0  ;;  %v242_v63 = vld [vmem:[%s1050_s1 + $0x188] sm:$0xff] }
  0xb5   :  { %v308_v6 = vpop.permute.xlu0 %307 }
  0xb6   :  { %454 = vst [vmem:[%s1051_s2 + $0xd0] sm:$0xff] %v401_v4  ;;  %455 = vst.msk [vmem:[%s1051_s2 + $0xd8] sm:$0xff] %vm428_vm0, %v402_v5  ;;  %v399_v9 = vmul.f32 %v308_v6, %v217_v2  ;;  %v400_v10 = vmul.f32 %v308_v6, %v218_v3 }
  0xb7   :  { %v323_v11 = vpop.permute.xlu1 %322 }
  0xb8   :  { %452 = vst [vmem:[%s1051_s2 + $0xc0] sm:$0xff] %v399_v9  ;;  %453 = vst.msk [vmem:[%s1051_s2 + $0xc8] sm:$0xff] %vm428_vm0, %v400_v10  ;;  %v405_v14 = vmul.f32 %v323_v11, %v223_v7  ;;  %v406_v15 = vmul.f32 %v323_v11, %v224_v8 }
  0xb9   :  { %v318_v16 = vpop.permute.xlu0 %317 }
  0xba   :  { %458 = vst [vmem:[%s1051_s2 + $0xf0] sm:$0xff] %v405_v14  ;;  %459 = vst.msk [vmem:[%s1051_s2 + $0xf8] sm:$0xff] %vm428_vm0, %v406_v15  ;;  %v403_v19 = vmul.f32 %v318_v16, %v221_v12  ;;  %v404_v20 = vmul.f32 %v318_v16, %v222_v13 }
  0xbb   :  { %v333_v21 = vpop.permute.xlu1 %332 }
  0xbc   :  { %456 = vst [vmem:[%s1051_s2 + $0xe0] sm:$0xff] %v403_v19  ;;  %457 = vst.msk [vmem:[%s1051_s2 + $0xe8] sm:$0xff] %vm428_vm0, %v404_v20  ;;  %v409_v24 = vmul.f32 %v333_v21, %v227_v17  ;;  %v410_v25 = vmul.f32 %v333_v21, %v228_v18 }
  0xbd   :  { %v328_v26 = vpop.permute.xlu0 %327 }
  0xbe   :  { %462 = vst [vmem:[%s1051_s2 + $0x110] sm:$0xff] %v409_v24  ;;  %463 = vst.msk [vmem:[%s1051_s2 + $0x118] sm:$0xff] %vm428_vm0, %v410_v25  ;;  %v407_v29 = vmul.f32 %v328_v26, %v225_v22  ;;  %v408_v30 = vmul.f32 %v328_v26, %v226_v23 }
  0xbf   :  { %v343_v31 = vpop.permute.xlu1 %342 }
  0xc0   :  { %460 = vst [vmem:[%s1051_s2 + $0x100] sm:$0xff] %v407_v29  ;;  %461 = vst.msk [vmem:[%s1051_s2 + $0x108] sm:$0xff] %vm428_vm0, %v408_v30  ;;  %v413_v34 = vmul.f32 %v343_v31, %v231_v27  ;;  %v414_v35 = vmul.f32 %v343_v31, %v232_v28 }
  0xc1   :  { %v338_v36 = vpop.permute.xlu0 %337 }
  0xc2   :  { %466 = vst [vmem:[%s1051_s2 + $0x130] sm:$0xff] %v413_v34  ;;  %467 = vst.msk [vmem:[%s1051_s2 + $0x138] sm:$0xff] %vm428_vm0, %v414_v35  ;;  %v411_v39 = vmul.f32 %v338_v36, %v229_v32  ;;  %v412_v40 = vmul.f32 %v338_v36, %v230_v33 }
  0xc3   :  { %v353_v41 = vpop.permute.xlu1 %352 }
  0xc4   :  { %464 = vst [vmem:[%s1051_s2 + $0x120] sm:$0xff] %v411_v39  ;;  %465 = vst.msk [vmem:[%s1051_s2 + $0x128] sm:$0xff] %vm428_vm0, %v412_v40  ;;  %v417_v44 = vmul.f32 %v353_v41, %v235_v37  ;;  %v418_v45 = vmul.f32 %v353_v41, %v236_v38 }
  0xc5   :  { %v348_v46 = vpop.permute.xlu0 %347 }
  0xc6   :  { %470 = vst [vmem:[%s1051_s2 + $0x150] sm:$0xff] %v417_v44  ;;  %471 = vst.msk [vmem:[%s1051_s2 + $0x158] sm:$0xff] %vm428_vm0, %v418_v45  ;;  %v415_v49 = vmul.f32 %v348_v46, %v233_v42  ;;  %v416_v50 = vmul.f32 %v348_v46, %v234_v43 }
  0xc7   :  { %v363_v51 = vpop.permute.xlu1 %362 }
  0xc8   :  { %468 = vst [vmem:[%s1051_s2 + $0x140] sm:$0xff] %v415_v49  ;;  %469 = vst.msk [vmem:[%s1051_s2 + $0x148] sm:$0xff] %vm428_vm0, %v416_v50  ;;  %v421_v54 = vmul.f32 %v363_v51, %v239_v47  ;;  %v422_v55 = vmul.f32 %v363_v51, %v240_v48 }
  0xc9   :  { %v358_v56 = vpop.permute.xlu0 %357 }
  0xca   :  { %474 = vst [vmem:[%s1051_s2 + $0x170] sm:$0xff] %v421_v54  ;;  %475 = vst.msk [vmem:[%s1051_s2 + $0x178] sm:$0xff] %vm428_vm0, %v422_v55  ;;  %v419_v59 = vmul.f32 %v358_v56, %v237_v52  ;;  %v420_v60 = vmul.f32 %v358_v56, %v238_v53 }
  0xcb   :  { %v373_v61 = vpop.permute.xlu1 %372 }
  0xcc   :  { %472 = vst [vmem:[%s1051_s2 + $0x160] sm:$0xff] %v419_v59  ;;  %473 = vst.msk [vmem:[%s1051_s2 + $0x168] sm:$0xff] %vm428_vm0, %v420_v60  ;;  %v425_v0 = vmul.f32 %v373_v61, %v243_v57  ;;  %v426_v1 = vmul.f32 %v373_v61, %v244_v58 }
  0xcd   :  { %v368_v2 = vpop.permute.xlu0 %367 }
  0xce   :  { %478 = vst [vmem:[%s1051_s2 + $0x190] sm:$0xff] %v425_v0  ;;  %479 = vst.msk [vmem:[%s1051_s2 + $0x198] sm:$0xff] %vm428_vm0, %v426_v1  ;;  %v423_v3 = vmul.f32 %v368_v2, %v241_v62  ;;  %v424_v4 = vmul.f32 %v368_v2, %v242_v63 }
  0xd0   :  { %476 = vst [vmem:[%s1051_s2 + $0x180] sm:$0xff] %v423_v3  ;;  %477 = vst.msk [vmem:[%s1051_s2 + $0x188] sm:$0xff] %vm428_vm0, %v424_v4 }

</bundles_post_ra>
